<compile_context>
chip_gen: v5e
topology: v5e:2x2
jax: 0.10.0
libtpu: 0.0.40
codegen_flags: <defaults>
</compile_context>

<pallas_src>
import functools

import jax
import jax.numpy as jnp
import numpy as np
from jax.experimental import pallas as pl
from jax.experimental.pallas import tpu as pltpu

EPS = 1e-5


def _bottleneck_kernel(x_ref, w1_ref, w2_ref, w3_ref, bias_ref, out_ref, *, H):
    """One block = B whole images stacked as a (B*H, W*C) lane-dense slab.

    x_ref   : (B*H, W*Cin)       f32   input slab (also the residual)
    w1_ref  : (W*Cin, W*width)   bf16  block-diag 1x1 conv1 (BN1 scale folded)
    w2_ref  : (3, W*width, W*width) bf16 banded 3x3 conv2, one per vertical tap
    w3_ref  : (W*width, W*Cout)  bf16  block-diag 1x1 conv3 (BN3 scale folded)
    bias_ref: (3, W*Cout)        f32   packed BN biases [t1 | t2 | t3] (lane-tiled)
    out_ref : (B*H, W*Cout)      f32
    """
    BH = x_ref.shape[0]
    n1 = w1_ref.shape[1]          # W*width
    n3 = w3_ref.shape[1]          # W*Cout

    # Hoist the packed bias rows once (broadcast along the row dimension).
    t1 = bias_ref[0:1, :n1]
    t2 = bias_ref[1:2, :n1]
    t3 = bias_ref[2:3, :n3]

    x = x_ref[...]                                        # (B*H, W*Cin) f32

    # ---- conv1 (1x1) + bn1 + relu: one stacked (B*H, 128) x (128, 32) matmul
    h1 = jnp.dot(x.astype(jnp.bfloat16), w1_ref[...],
                 preferred_element_type=jnp.float32)
    h1 = jnp.maximum(h1 + t1, 0.0)                        # (B*H, W*width) f32

    # ---- conv2 (3x3, pad=1, stride=1) ----
    # Vertical taps via sublane roll (+1 / -1 row) with per-image boundary
    # masking; horizontal taps + horizontal zero-pad live in the banded w2.
    row = jax.lax.broadcasted_iota(jnp.int32, h1.shape, 0) % H
    up = jnp.where(row == 0, 0.0, pltpu.roll(h1, 1, 0))        # row y-1
    dn = jnp.where(row == H - 1, 0.0, pltpu.roll(h1, BH - 1, 0))  # row y+1

    acc = jnp.dot(up.astype(jnp.bfloat16), w2_ref[0],
                  preferred_element_type=jnp.float32)
    acc = acc + jnp.dot(h1.astype(jnp.bfloat16), w2_ref[1],
                        preferred_element_type=jnp.float32)
    acc = acc + jnp.dot(dn.astype(jnp.bfloat16), w2_ref[2],
                        preferred_element_type=jnp.float32)
    h2 = jnp.maximum(acc + t2, 0.0)                       # (B*H, W*width) f32

    # ---- conv3 (1x1) + bn3 + residual; lane-dense (B*H, W*Cout) store ----
    out = jnp.dot(h2.astype(jnp.bfloat16), w3_ref[...],
                  preferred_element_type=jnp.float32)
    out_ref[...] = (out + t3 + x).astype(out_ref.dtype)


def make_bottleneck_params(w1_t, bn1, w2_t, bn2, w3_t, bn3, W):
    """PyTorch-layout params -> slab-matmul kernel params (built on host).

    w1_t: (width, Cin, 1, 1), w2_t: (width, width, 3, 3), w3_t: (Cout, width, 1, 1)
    bn*: (gamma, beta, running_mean, running_var)
    """
    w1_t, w2_t, w3_t = (np.asarray(w, np.float32) for w in (w1_t, w2_t, w3_t))
    width, Cin = w1_t.shape[0], w1_t.shape[1]
    Cout = w3_t.shape[0]

    # Folded inference-mode BN: y*s + t, with s folded into the conv weights.
    def fold(bn):
        g, b, m, v = (np.asarray(a, np.float32) for a in bn)
        s = g / np.sqrt(v + np.float32(EPS))
        return s, b - m * s

    s1, t1 = fold(bn1)
    s2, t2 = fold(bn2)
    s3, t3 = fold(bn3)

    w1 = w1_t[:, :, 0, 0].T * s1[None, :]                 # (Cin, width)
    w3 = w3_t[:, :, 0, 0].T * s3[None, :]                 # (width, Cout)

    # Block-diagonal 1x1 convs over the W pixels of a row-slab.
    w1bd = np.zeros((W * Cin, W * width), np.float32)
    w3bd = np.zeros((W * width, W * Cout), np.float32)
    for x in range(W):
        w1bd[x * Cin:(x + 1) * Cin, x * width:(x + 1) * width] = w1
        w3bd[x * width:(x + 1) * width, x * Cout:(x + 1) * Cout] = w3

    # Banded 3x3 conv: one (W*width, W*width) matrix per vertical tap dy;
    # horizontal taps dx and the 1-pixel horizontal zero padding are encoded
    # by the band structure (out-of-range columns simply have no band).
    w2bd = np.zeros((3, W * width, W * width), np.float32)
    for dy in range(3):
        for x in range(W):
            for dx in range(3):
                p = x + dx - 1
                if 0 <= p < W:
                    w2bd[dy,
                         p * width:(p + 1) * width,
                         x * width:(x + 1) * width] = \
                        (w2_t[:, :, dy, dx] * s2[:, None]).T   # (ci, co)

    # Packed BN biases, tiled along slab lanes -> single (3, W*Cout) f32 DMA.
    L = max(W * width, W * Cout)
    bias = np.zeros((3, L), np.float32)
    bias[0, :W * width] = np.tile(t1, W)
    bias[1, :W * width] = np.tile(t2, W)
    bias[2, :W * Cout] = np.tile(t3, W)

    return (jnp.asarray(w1bd, jnp.bfloat16),
            jnp.asarray(w2bd, jnp.bfloat16),
            jnp.asarray(w3bd, jnp.bfloat16),
            jnp.asarray(bias, jnp.float32))


def _choose_block_batch(N, H):
    """Pick images-per-block B: B | N, B*H obeys the (8,128) block rule,
    B*H <= ~256 rows (MXU M tile), and >=2 grid blocks when N allows (v7x)."""
    target = max(1, 256 // H)
    divisors = [b for b in range(1, N + 1) if N % b == 0]
    ok = [b for b in divisors if (b * H) % 8 == 0 or b == N] or divisors
    fits = [b for b in ok if b <= target] or [min(ok)]
    two = [b for b in fits if N // b >= 2]
    return max(two) if two else max(fits)


def bottleneck_pallas(x_nhwc, kparams, *, block_batch=None):
    """x_nhwc: (N, H, W, Cin) float32.  Returns (N, H, W, Cout=Cin) float32."""
    N, H, W, Cin = x_nhwc.shape
    w1bd, w2bd, w3bd, bias = kparams
    width = w1bd.shape[1] // W
    Cout = w3bd.shape[1] // W
    assert Cout == Cin, "residual add requires inplanes == planes * expansion"
    assert w1bd.shape[0] == W * Cin
    assert width == w2bd.shape[1] // W

    B = _choose_block_batch(N, H) if block_batch is None else block_batch
    assert N % B == 0
    BH = B * H

    # Lane-dense slab: (N*H, W*Cin); rows of each image are contiguous.
    x_slab = x_nhwc.reshape(N * H, W * Cin)

    kernel = functools.partial(_bottleneck_kernel, H=H)

    grid_spec = pltpu.PrefetchScalarGridSpec(
        num_scalar_prefetch=0,
        grid=(N // B,),
        in_specs=[
            pl.BlockSpec((BH, W * Cin), lambda n: (n, 0)),
            pl.BlockSpec(w1bd.shape, lambda n: (0, 0)),
            pl.BlockSpec(w2bd.shape, lambda n: (0, 0, 0)),
            pl.BlockSpec(w3bd.shape, lambda n: (0, 0)),
            pl.BlockSpec(bias.shape, lambda n: (0, 0)),
        ],
        out_specs=pl.BlockSpec((BH, W * Cout), lambda n: (n, 0)),
    )

    out_slab = pl.pallas_call(
        kernel,
        out_shape=jax.ShapeDtypeStruct((N * H, W * Cout), jnp.float32),
        grid_spec=grid_spec,
        compiler_params=pltpu.CompilerParams(
            dimension_semantics=("parallel",)),
    )(x_slab, w1bd, w2bd, w3bd, bias)
    return out_slab.reshape(N, H, W, Cout)


# ---------------- plain-JAX reference (for verification) ----------------
def _bn_ref(y, gamma, beta, mean, var):
    inv = gamma / jnp.sqrt(var + EPS)
    return (y - mean[None, :, None, None]) * inv[None, :, None, None] + \
        beta[None, :, None, None]


def bottleneck_ref(x_nchw, tparams):
    (w1, g1, be1, m1, v1, w2, g2, be2, m2, v2, w3, g3, be3, m3, v3) = tparams
    conv = lambda y, w, pad: jax.lax.conv_general_dilated(
        y, w, (1, 1), pad, dimension_numbers=('NCHW', 'OIHW', 'NCHW'))
    out = jnp.maximum(_bn_ref(conv(x_nchw, w1, 'VALID'), g1, be1, m1, v1), 0.0)
    out = jnp.maximum(_bn_ref(conv(out, w2, [(1, 1), (1, 1)]), g2, be2, m2, v2), 0.0)
    out = _bn_ref(conv(out, w3, 'VALID'), g3, be3, m3, v3)
    return out + x_nchw


if __name__ == "__main__":
    # Module config: Bottleneck(inplanes=16, planes=4), expansion=4 -> Cout=16,
    # stride=1, groups=1, base_width=64 -> width=4, downsample=None.
    N, inplanes, planes, Hs, Ws = 4, 16, 4, 8, 8
    width = planes            # int(planes * (64/64)) * 1
    Cout = planes * 4         # expansion

    key = jax.random.PRNGKey(0)
    ks = jax.random.split(key, 16)

    # PyTorch-layout parameters (OIHW conv weights, per-channel BN params).
    w1_t = 0.1 * jax.random.normal(ks[0], (width, inplanes, 1, 1), jnp.float32)
    w2_t = 0.1 * jax.random.normal(ks[1], (width, width, 3, 3), jnp.float32)
    w3_t = 0.1 * jax.random.normal(ks[2], (Cout, width, 1, 1), jnp.float32)

    def bn_params(k, c):
        k1, k2, k3, k4 = jax.random.split(k, 4)
        gamma = 1.0 + 0.1 * jax.random.normal(k1, (c,), jnp.float32)
        beta = 0.1 * jax.random.normal(k2, (c,), jnp.float32)
        mean = 0.1 * jax.random.normal(k3, (c,), jnp.float32)
        var = jax.random.uniform(k4, (c,), jnp.float32, 0.5, 1.5)
        return gamma, beta, mean, var

    bn1 = bn_params(ks[3], width)
    bn2 = bn_params(ks[4], width)
    bn3 = bn_params(ks[5], Cout)

    kparams = make_bottleneck_params(w1_t, bn1, w2_t, bn2, w3_t, bn3, Ws)

    x_nchw = jax.random.normal(ks[6], (N, inplanes, Hs, Ws), jnp.float32)
    x_nhwc = jnp.transpose(x_nchw, (0, 2, 3, 1))

    out_nhwc = jax.block_until_ready(bottleneck_pallas(x_nhwc, kparams))
    out_nchw = jnp.transpose(out_nhwc, (0, 3, 1, 2))

    ref = bottleneck_ref(x_nchw, (w1_t, *bn1, w2_t, *bn2, w3_t, *bn3))

    assert out_nchw.shape == (N, Cout, Hs, Ws)
    # bf16 MXU operands (with f32 accumulation / f32 residual) -> bf16-level tol.
    max_err = float(jnp.max(jnp.abs(out_nchw - ref)))
    assert jnp.allclose(out_nchw, ref, rtol=1e-2, atol=1e-2), max_err
    print("KERNEL_OK")
</pallas_src>

<mosaic_0001>
module attributes {stable_mosaic.version = 11 : i64} {
  func.func @_bottleneck_kernel(%arg0: i32, %arg1: memref<16x128xf32, #tpu.memory_space<vmem>>, %arg2: memref<128x32xbf16, #tpu.memory_space<vmem>>, %arg3: memref<3x32x32xbf16, #tpu.memory_space<vmem>>, %arg4: memref<32x128xbf16, #tpu.memory_space<vmem>>, %arg5: memref<3x128xf32, #tpu.memory_space<vmem>>, %arg6: memref<16x128xf32, #tpu.memory_space<vmem>>) attributes {dimension_semantics = [#tpu.dimension_semantics<parallel>], iteration_bounds = array<i64: 2>, scalar_prefetch = 0 : i64, scratch_operands = 0 : i64, tpu.core_type = #tpu.core_type<tc>, window_params = [{transform_indices = @transform_0, window_bounds = array<i64: 16, 128>}, {pipeline_mode = #tpu.pipeline_mode<synchronous>, transform_indices = @transform_1, window_bounds = array<i64: 128, 32>}, {pipeline_mode = #tpu.pipeline_mode<synchronous>, transform_indices = @transform_2, window_bounds = array<i64: 3, 32, 32>}, {pipeline_mode = #tpu.pipeline_mode<synchronous>, transform_indices = @transform_3, window_bounds = array<i64: 32, 128>}, {pipeline_mode = #tpu.pipeline_mode<synchronous>, transform_indices = @transform_4, window_bounds = array<i64: 3, 128>}, {transform_indices = @transform_5, window_bounds = array<i64: 16, 128>}]} {
    %c0 = arith.constant 0 : index
    %c0_0 = arith.constant 0 : index
    %0 = vector.load %arg5[%c0, %c0_0] : memref<3x128xf32, #tpu.memory_space<vmem>>, vector<1x32xf32>
    %c1 = arith.constant 1 : index
    %c0_1 = arith.constant 0 : index
    %1 = vector.load %arg5[%c1, %c0_1] : memref<3x128xf32, #tpu.memory_space<vmem>>, vector<1x32xf32>
    %c2 = arith.constant 2 : index
    %c0_2 = arith.constant 0 : index
    %2 = vector.load %arg5[%c2, %c0_2] : memref<3x128xf32, #tpu.memory_space<vmem>>, vector<1x128xf32>
    %c0_3 = arith.constant 0 : index
    %c0_4 = arith.constant 0 : index
    %3 = vector.load %arg1[%c0_3, %c0_4] : memref<16x128xf32, #tpu.memory_space<vmem>>, vector<16x128xf32>
    %4 = arith.truncf %3 : vector<16x128xf32> to vector<16x128xbf16>
    %c0_5 = arith.constant 0 : index
    %c0_6 = arith.constant 0 : index
    %5 = vector.load %arg2[%c0_5, %c0_6] : memref<128x32xbf16, #tpu.memory_space<vmem>>, vector<128x32xbf16>
    %cst = arith.constant dense<0.000000e+00> : vector<16x32xf32>
    %6 = tpu.matmul %4, %5, %cst {dimension_numbers = #tpu.dot_dimension_numbers<[1], [0], [0], [1], [0, 0, 1, 1], [], []>} : vector<16x128xbf16>, vector<128x32xbf16>, vector<16x32xf32> -> vector<16x32xf32>
    %7 = vector.broadcast %0 : vector<1x32xf32> to vector<16x32xf32>
    %8 = arith.addf %6, %7 : vector<16x32xf32>
    %cst_7 = arith.constant 0.000000e+00 : f32
    %9 = vector.broadcast %cst_7 : f32 to vector<16x32xf32>
    %10 = arith.maximumf %8, %9 : vector<16x32xf32>
    %11 = tpu.iota {dimensions = array<i32: 0>} : vector<16x32xi32>
    %c8_i32 = arith.constant 8 : i32
    %c0_i32 = arith.constant 0 : i32
    %12 = arith.cmpi eq, %c8_i32, %c0_i32 : i32
    %c1_i32 = arith.constant 1 : i32
    %13 = arith.select %12, %c1_i32, %c8_i32 : i32
    %14 = vector.broadcast %13 : i32 to vector<16x32xi32>
    %15 = arith.remsi %11, %14 : vector<16x32xi32>
    %c0_i32_8 = arith.constant 0 : i32
    %16 = vector.broadcast %c0_i32_8 : i32 to vector<16x32xi32>
    %17 = arith.cmpi ne, %15, %16 : vector<16x32xi32>
    %c0_i32_9 = arith.constant 0 : i32
    %18 = vector.broadcast %c0_i32_9 : i32 to vector<16x32xi32>
    %19 = arith.cmpi slt, %15, %18 : vector<16x32xi32>
    %c0_i32_10 = arith.constant 0 : i32
    %20 = arith.cmpi slt, %13, %c0_i32_10 : i32
    %21 = vector.broadcast %20 : i1 to vector<16x32xi1>
    %22 = vector.broadcast %21 : vector<16x32xi1> to vector<16x32xi1>
    %23 = arith.xori %19, %22 : vector<16x32xi1>
    %24 = arith.andi %23, %17 : vector<16x32xi1>
    %25 = vector.broadcast %13 : i32 to vector<16x32xi32>
    %26 = arith.addi %15, %25 : vector<16x32xi32>
    %27 = arith.select %24, %26, %15 : vector<16x32xi1>, vector<16x32xi32>
    %c0_i32_11 = arith.constant 0 : i32
    %28 = vector.broadcast %c0_i32_11 : i32 to vector<16x32xi32>
    %29 = arith.cmpi eq, %27, %28 : vector<16x32xi32>
    %c1_i32_12 = arith.constant 1 : i32
    %30 = tpu.dynamic_rotate %10 by %c1_i32_12 dim 0 : vector<16x32xf32>, i32 -> vector<16x32xf32>
    %cst_13 = arith.constant 0.000000e+00 : f32
    %31 = vector.broadcast %cst_13 : f32 to vector<16x32xf32>
    %32 = arith.select %29, %31, %30 : vector<16x32xi1>, vector<16x32xf32>
    %c7_i32 = arith.constant 7 : i32
    %33 = vector.broadcast %c7_i32 : i32 to vector<16x32xi32>
    %34 = arith.cmpi eq, %27, %33 : vector<16x32xi32>
    %c15_i32 = arith.constant 15 : i32
    %35 = tpu.dynamic_rotate %10 by %c15_i32 dim 0 : vector<16x32xf32>, i32 -> vector<16x32xf32>
    %cst_14 = arith.constant 0.000000e+00 : f32
    %36 = vector.broadcast %cst_14 : f32 to vector<16x32xf32>
    %37 = arith.select %34, %36, %35 : vector<16x32xi1>, vector<16x32xf32>
    %38 = arith.truncf %32 : vector<16x32xf32> to vector<16x32xbf16>
    %c0_15 = arith.constant 0 : index
    %c0_16 = arith.constant 0 : index
    %c0_17 = arith.constant 0 : index
    %39 = vector.load %arg3[%c0_15, %c0_16, %c0_17] : memref<3x32x32xbf16, #tpu.memory_space<vmem>>, vector<1x32x32xbf16>
    %40 = vector.shape_cast %39 : vector<1x32x32xbf16> to vector<32x32xbf16>
    %cst_18 = arith.constant dense<0.000000e+00> : vector<16x32xf32>
    %41 = tpu.matmul %38, %40, %cst_18 {dimension_numbers = #tpu.dot_dimension_numbers<[1], [0], [0], [1], [0, 0, 1, 1], [], []>} : vector<16x32xbf16>, vector<32x32xbf16>, vector<16x32xf32> -> vector<16x32xf32>
    %42 = arith.truncf %10 : vector<16x32xf32> to vector<16x32xbf16>
    %c1_19 = arith.constant 1 : index
    %c0_20 = arith.constant 0 : index
    %c0_21 = arith.constant 0 : index
    %43 = vector.load %arg3[%c1_19, %c0_20, %c0_21] : memref<3x32x32xbf16, #tpu.memory_space<vmem>>, vector<1x32x32xbf16>
    %44 = vector.shape_cast %43 : vector<1x32x32xbf16> to vector<32x32xbf16>
    %cst_22 = arith.constant dense<0.000000e+00> : vector<16x32xf32>
    %45 = tpu.matmul %42, %44, %cst_22 {dimension_numbers = #tpu.dot_dimension_numbers<[1], [0], [0], [1], [0, 0, 1, 1], [], []>} : vector<16x32xbf16>, vector<32x32xbf16>, vector<16x32xf32> -> vector<16x32xf32>
    %46 = arith.addf %41, %45 : vector<16x32xf32>
    %47 = arith.truncf %37 : vector<16x32xf32> to vector<16x32xbf16>
    %c2_23 = arith.constant 2 : index
    %c0_24 = arith.constant 0 : index
    %c0_25 = arith.constant 0 : index
    %48 = vector.load %arg3[%c2_23, %c0_24, %c0_25] : memref<3x32x32xbf16, #tpu.memory_space<vmem>>, vector<1x32x32xbf16>
    %49 = vector.shape_cast %48 : vector<1x32x32xbf16> to vector<32x32xbf16>
    %cst_26 = arith.constant dense<0.000000e+00> : vector<16x32xf32>
    %50 = tpu.matmul %47, %49, %cst_26 {dimension_numbers = #tpu.dot_dimension_numbers<[1], [0], [0], [1], [0, 0, 1, 1], [], []>} : vector<16x32xbf16>, vector<32x32xbf16>, vector<16x32xf32> -> vector<16x32xf32>
    %51 = arith.addf %46, %50 : vector<16x32xf32>
    %52 = vector.broadcast %1 : vector<1x32xf32> to vector<16x32xf32>
    %53 = arith.addf %51, %52 : vector<16x32xf32>
    %cst_27 = arith.constant 0.000000e+00 : f32
    %54 = vector.broadcast %cst_27 : f32 to vector<16x32xf32>
    %55 = arith.maximumf %53, %54 : vector<16x32xf32>
    %56 = arith.truncf %55 : vector<16x32xf32> to vector<16x32xbf16>
    %c0_28 = arith.constant 0 : index
    %c0_29 = arith.constant 0 : index
    %57 = vector.load %arg4[%c0_28, %c0_29] : memref<32x128xbf16, #tpu.memory_space<vmem>>, vector<32x128xbf16>
    %cst_30 = arith.constant dense<0.000000e+00> : vector<16x128xf32>
    %58 = tpu.matmul %56, %57, %cst_30 {dimension_numbers = #tpu.dot_dimension_numbers<[1], [0], [0], [1], [0, 0, 1, 1], [], []>} : vector<16x32xbf16>, vector<32x128xbf16>, vector<16x128xf32> -> vector<16x128xf32>
    %59 = vector.broadcast %2 : vector<1x128xf32> to vector<16x128xf32>
    %60 = arith.addf %58, %59 : vector<16x128xf32>
    %61 = arith.addf %60, %3 : vector<16x128xf32>
    %c0_31 = arith.constant 0 : index
    %c0_32 = arith.constant 0 : index
    %62 = vector.load %arg6[%c0_31, %c0_32] : memref<16x128xf32, #tpu.memory_space<vmem>>, vector<16x128xf32>
    tpu.vector_store %arg6[%c0_31, %c0_32], %61 {strides = array<i32>} : memref<16x128xf32, #tpu.memory_space<vmem>>, vector<16x128xf32>,
    return
  }
  func.func @transform_0(%arg0: i32) -> (i32, i32) {
    %c0_i32 = arith.constant 0 : i32
    %c0_i32_0 = arith.constant 0 : i32
    return %arg0, %c0_i32 : i32, i32
  }
  func.func @transform_1(%arg0: i32) -> (i32, i32) {
    %c0_i32 = arith.constant 0 : i32
    %c0_i32_0 = arith.constant 0 : i32
    %c0_i32_1 = arith.constant 0 : i32
    return %c0_i32, %c0_i32_0 : i32, i32
  }
  func.func @transform_2(%arg0: i32) -> (i32, i32, i32) {
    %c0_i32 = arith.constant 0 : i32
    %c0_i32_0 = arith.constant 0 : i32
    %c0_i32_1 = arith.constant 0 : i32
    %c0_i32_2 = arith.constant 0 : i32
    return %c0_i32, %c0_i32_0, %c0_i32_1 : i32, i32, i32
  }
  func.func @transform_3(%arg0: i32) -> (i32, i32) {
    %c0_i32 = arith.constant 0 : i32
    %c0_i32_0 = arith.constant 0 : i32
    %c0_i32_1 = arith.constant 0 : i32
    return %c0_i32, %c0_i32_0 : i32, i32
  }
  func.func @transform_4(%arg0: i32) -> (i32, i32) {
    %c0_i32 = arith.constant 0 : i32
    %c0_i32_0 = arith.constant 0 : i32
    %c0_i32_1 = arith.constant 0 : i32
    return %c0_i32, %c0_i32_0 : i32, i32
  }
  func.func @transform_5(%arg0: i32) -> (i32, i32) {
    %c0_i32 = arith.constant 0 : i32
    %c0_i32_0 = arith.constant 0 : i32
    return %arg0, %c0_i32 : i32, i32
  }
}

</mosaic_0001>

<bundles_post_ra>
// kernel: tpu_custom_call.1
= control target key start
LH: loop header
LB: loop body
LE: loop exit
PB: predicated region body
PF: predicated region fallthrough
CT: control target
= control target key end

     0   :  { %10 = vsyncpa [#allocation3], 0  ;;  %s1167_s0 = inlined_call_operand.vmem [shape: f32[32,128], index: 0, kind: input, shape index: {}]   ;;  %s1168_s1 = inlined_call_operand.vmem [shape: bf16[128,32], index: 1, kind: input, shape index: {}]   ;;  %s1169_s2 = inlined_call_operand.vmem [shape: bf16[3,32,32], index: 2, kind: input, shape index: {}]   ;;  %s1170_s3 = inlined_call_operand.hbm [shape: bf16[32,128], index: 3, kind: input, shape index: {}]   ;;  %s1171_s4 = inlined_call_operand.hbm [shape: f32[3,128], index: 4, kind: input, shape index: {}]   ;;  %s1172_s5 = inlined_call_operand.hbm [shape: f32[32,128], index: 5, kind: output, shape index: {}]  }
   0x1   :  { %11 = vsyncpa [#allocation6], 0 }
   0x2   :  { %12 = vsyncpa [#allocation4], 0 }
   0x3   :  { %14 = vsyncpa [#allocation4 + $0x1], 0  ;;  %s986_s18 = smov 0   ;;  %s988_s19 = smov 0  }
   0x4   :  { %s990_s20 = smov 0   ;;  %s992_s21 = smov 0  }
   0x5 LB: > { %s1007_s22 = sadd.s32 4294967295, %s948_s21   ;;  %s642_s23 = sadd.s32 4294967294, %s948_s21   ;;  %s948_s21 = sphi %s992_s21, %s1185_s21   ;;  %s944_s20 = sphi %s990_s20, %s1184_s20   ;;  %s940_s19 = sphi %s988_s19, %s1183_s19   ;;  %s936_s18 = sphi %s986_s18, %s1182_s18  }
   0x6   : > { %s1011_s24 = sadd.s32 1, %s948_s21   ;;  %s137_s25 = sadd.s32 1, %s944_s20 }
   0x7   : > { %s134_s26 = ssub.s32 %s948_s21, %s1011_s24  ;;  %p147_p0 = scmp.ne.s32.totalorder %s944_s20, %s940_s19 }
   0x8   : > { %p135_p1 = scmp.eq.s32.totalorder %s134_s26, 0  ;;  %p148_p2 = scmp.eq.s32.totalorder %s1007_s22, 1 }
   0x9   : > { %p153_p3 = scmp.ne.s32.totalorder %s940_s19, %s936_s18  ;;  %p154_p4 = scmp.eq.s32.totalorder %s642_s23, 1 }
   0xa   : > { %s1022_s27 = scalar_select %p135_p1, %s944_s20, %s137_s25  }
   0xb   : > { %p1024_p5 = por %p148_p2, %p147_p0  ;;  %p1028_p6 = por %p154_p4, %p153_p3 }
   0xc   : > { %p643_p7 = scmp.ge.s32.totalorder %s948_s21, 1  ;;  %p161_p8 = scmp.lt.s32.totalorder %s948_s21, 3 }
   0xd   : > { %p772_p9 = scmp.eq.s32.totalorder %s1007_s22, 0  ;;  %s178_s8 = sshll.u32 %s1170_s3, 4  ;;  %s179_s8 = int_to_ptr.hbm [resolvable:$true] %s178_s8 }
   0xe   : > { %p1035_p10 = pnand %p643_p7, %p161_p8  ;;  %s950_s9 = smov [#allocation2]  }
   0xf   : > { %s180_s10 = sshll.u32 %s950_s9, 4  ;;  %s193_s13 = sshll.u32 %s1171_s4, 4  ;;  %s181_s10 = int_to_ptr.vmem [resolvable:$true] %s180_s10  ;;  %s194_s13 = int_to_ptr.hbm [resolvable:$true] %s193_s13 }
  0x10   : > { %p761_p11 = pneg %p1035_p10  ;;  %s951_s14 = smov 64  }
  0x11   : > { %s952_s15 = smov 4   ;;  %s953_s16 = smov [#allocation5]  }
  0x12   : > { %p762_p12 = pnand %p772_p9, %p761_p11  ;;  %s195_s17 = sshll.u32 %s953_s16, 4  ;;  %s196_s17 = int_to_ptr.vmem [resolvable:$true] %s195_s17 }
  0x13   : > { %217 = sbr.rel (%p1035_p10) target bundleno = 495 (0x1ef), region = 40 }
  0x14   : > { %764 = dma.hbm_to_vmem [thread:$0]  (!%p762_p12), %s179_s8, 256, %s181_s10, [#allocation3], %s951_s14, %s951_s14, %s952_s15  }
  0x15   : > { %767 = dma.hbm_to_vmem [thread:$0]  (!%p762_p12), %s194_s13, 64, %s196_s17, [#allocation6]  }
  0x18   : > { %923 = dma.done.wait (%p772_p9), [#allocation3], 256  }
  0x19   : > { %925 = vsyncadd (%p772_p9), [#allocation3], 4294967040 }
  0x1a   : > { %927 = dma.done.wait (%p772_p9), [#allocation6], 64  }
  0x1b   : > { %929 = vsyncadd (%p772_p9), [#allocation6], 4294967232  ;;  %v741_v0 = vld [vmem:[%s1168_s1 + $0x38] sm:$0xff]  ;;  %v740_v1 = vld [vmem:[%s1168_s1 + $0x30] sm:$0xff]  ;;  %s651_s8 = sshll.u32 %s1007_s22, 1  ;;  %v346_v17 = vlaneseq  ;;  %vm414_vm0 = vcmask 261120  }
  0x1c   : > { %330 = vmatpush.bf16.msra.mxu0 %v741_v0  ;;  %v739_v2 = vld [vmem:[%s1168_s1 + $0x28] sm:$0xff]  ;;  %v738_v3 = vld [vmem:[%s1168_s1 + $0x20] sm:$0xff]  ;;  %p252_p13 = scmp.lt.s32.totalorder %s651_s8, 3  ;;  %v737_v4 = vld [vmem:[%s1168_s1 + $0x18] sm:$0xff]  ;;  %s248_s25 = sand.u32 1, %s940_s19  }
  0x1d   : > { %v736_v5 = vld [vmem:[%s1168_s1 + $0x10] sm:$0xff]  ;;  %v735_v6 = vld [vmem:[%s1168_s1 + $0x8] sm:$0xff]  ;;  %v734_v7 = vld [vmem:[%s1168_s1] sm:$0xff]  ;;  %v347_v20 = vshrl.u32 %v346_v17, 7  ;;  %s750_s30 = sshll.u32 %s1007_s22, 4  ;;  %s543_s12 = scalar_lea.sflag [#allocation4], %s248_s25 }
  0x1e   : > { %s1187_s8 = smov (!%p252_p13, %s651_s8), 3  ;;  %v745_v11 = vld [vmem:[%s1169_s2 + $0x18] sm:$0xff]  ;;  %v744_v12 = vld [vmem:[%s1169_s2 + $0x10] sm:$0xff]  ;;  %v743_v13 = vld [vmem:[%s1169_s2 + $0x8] sm:$0xff]  ;;  %s898_s16 = scalar_lea.hbm %s1172_s5, 32 }
  0x1f   : > { %s652_s15 = sshll.u32 %s1187_s8, 3  ;;  %424 = vmatpush.bf16.msra.mxu1 %v745_v11  ;;  %v747_v14 = vld [vmem:[%s1169_s2 + $0x28] sm:$0xff]  ;;  %453 = vmatpush.bf16.msra.mxu2 %v743_v13  ;;  %v742_v15 = vld [vmem:[%s1169_s2] sm:$0xff]  ;;  %v815_v18 = vld [vmem:[#allocation5] ss:$0 sm:$0xff]  ;;  %v348_v22 = vadd.s32 8, %v347_v20  ;;  %s554_s8 = scalar_lea.hbm %s1172_s5, %s750_s30 }
  0x20   : > { %331 = vmatpush.bf16.msra.mxu0 %v740_v1  ;;  %s255_s26 = scalar_lea.vmem %s1167_s0, %s652_s15  ;;  %488 = vmatpush.bf16.msra.mxu3 %v747_v14  ;;  %v746_v16 = vld [vmem:[%s1169_s2 + $0x20] sm:$0xff]  ;;  %v353_v23 = vand.u32 7, %v347_v20  ;;  %vm377_vm2 = vcmp.lt.s32.totalorder %v347_v20, 1  ;;  %vm386_vm3 = vcmp.lt.s32.totalorder %v347_v20, 7  ;;  %v749_v47 = vld [vmem:[#allocation2 + $0x8] sm:$0xff]  ;;  %s557_s11 = sshll.u32 %s554_s8, 4  ;;  %s558_s11 = int_to_ptr.hbm [resolvable:$true] %s557_s11 }
  0x21   : > { %v1087_v8 = vld [vmem:[%s255_s26] sm:$0xff]  ;;  %v1089_v9 = vld [vmem:[%s255_s26 + $0x8] sm:$0xff]  ;;  %v360_v26 = vand.u32 7, %v348_v22  ;;  %v816_v54 = vld [vmem:[#allocation5 + $0x1] ss:$0 sm:$0xff]  ;;  %s650_s26 = sshll.u32 %s248_s25, 4 }
  0x22   : > { %v264_v10 = vpack.c.bf16 %v1089_v9, %v1087_v8  ;;  %vm1111_vm1 = vcmp.eq.s32.totalorder %v353_v23, 0  ;;  %vm1119_vm5 = vcmp.eq.s32.totalorder %v353_v23, 7  ;;  %v748_v48 = vld [vmem:[#allocation2] sm:$0xff]  ;;  %v817_v1 = vld [vmem:[#allocation5 + $0x2] ss:$0 sm:$0xff]  ;;  %s250_s9 = scalar_lea.vmem [#allocation7], %s650_s26 }
  0x23   : > { %425 = vmatpush.bf16.msra.mxu1 %v744_v12  ;;  %454 = vmatpush.bf16.msra.mxu2 %v742_v15  ;;  %vm1115_vm4 = vcmp.eq.s32.totalorder %v360_v26, 0  ;;  %vm383_vm6 = vcmp.eq.s32.totalorder %v360_v26, 7  ;;  %s555_s10 = sshll.u32 %s250_s9, 4  ;;  %s892_s22 = sshra.s32 %s558_s11, 4  ;;  %s556_s10 = int_to_ptr.vmem [resolvable:$true] %s555_s10  ;;  %s893_s22 = int_to_ptr.hbm [resolvable:$true] %s892_s22 }
  0x24   : > { %332 = vmatpush.bf16.msra.mxu0 %v739_v2  ;;  %489 = vmatpush.bf16.msra.mxu3 %v746_v16  ;;  %s894_s13 = scalar_lea.hbm %s893_s22, 16  ;;  %p899_p3 = scmp.lt.s32.totalorder %s893_s22, %s1172_s5 }
  0x25   : > { %p895_p0 = scmp.ne.s32.totalorder %s893_s22, %s894_s13  ;;  %p900_p4 = scmp.lt.s32.totalorder %s898_s16, %s894_s13 }
  0x27   : > { %530 = vmatpush.bf16.msrb.mxu1 %v749_v47  ;;  %p896_p1 = pnand %p895_p0, %p1024_p5  ;;  %p901_p7 = por %p900_p4, %p899_p3 }
  0x28   : > { %333 = vmatpush.bf16.msra.mxu0 %v738_v3 }
  0x29   : > { %p897_p2 = pneg %p896_p1 }
  0x2b   : > { %531 = vmatpush.bf16.msrb.mxu1 %v748_v48  ;;  %p902_p8 = pnand %p901_p7, %p897_p2 }
  0x2c   : > { %334 = vmatpush.bf16.msra.mxu0 %v737_v4 }
  0x30   : > { %335 = vmatpush.bf16.msra.mxu0 %v736_v5 }
  0x34   : > { %336 = vmatpush.bf16.msra.mxu0 %v735_v6 }
  0x38   : > { %337 = vmatpush.bf16.msra.mxu0 %v734_v7 }
  0x3b   : > { %338 = vmatmul.bf16.vlgmr.msra.gmra.mxu0 %v264_v10 }
  0xb8   : > { %v339_v19 = vpop.f32.mrf.mxu0 }
  0xb9   : > { %v340_v21 = vadd.f32 %v815_v18, %v339_v19 }
  0xbb   : > { %v344_v24 = vmax.f32 %v340_v21, 0.0 }
  0xbd   : > { %v375_v30 = vrot.slane %v344_v24, 7  ;;  %v384_v33 = vrot.slane %v344_v24, 1 }
  0xc0   : > { %v341_v25 = vpop.f32.mrf.mxu0 }
  0xc1   : > { %v342_v27 = vadd.f32 %v815_v18, %v341_v25 }
  0xc3   : > { %v345_v28 = vmax.f32 %v342_v27, 0.0 }
  0xc5   : > { %v376_v34 = vrot.slane %v345_v28, 7  ;;  %v385_v35 = vrot.slane %v345_v28, 1  ;;  %v396_v36 = vpack.c.bf16 %v345_v28, %v344_v24 }
  0xc7   : > { %697 = vmatmul.msk.bf16.vlgmr.msra.gmra.mxu1 %vm414_vm0, %v396_v36  ;;  %v378_v37 = vsel %vm377_vm2, %v375_v30, %v376_v34  ;;  %v379_v38 = vsel %vm377_vm2, %v376_v34, %v375_v30  ;;  %v387_v39 = vsel %vm386_vm3, %v384_v33, %v385_v35  ;;  %v388_v40 = vsel %vm386_vm3, %v385_v35, %v384_v33 }
  0xc8   : > { %v380_v41 = vsel %vm1111_vm1, 0.0, %v379_v38  ;;  %v381_v42 = vsel %vm1115_vm4, 0.0, %v378_v37  ;;  %v389_v43 = vsel %vm1119_vm5, 0.0, %v387_v39  ;;  %v390_v44 = vsel %vm383_vm6, 0.0, %v388_v40 }
  0xc9   : > { %v391_v45 = vpack.c.bf16 %v381_v42, %v380_v41  ;;  %v461_v46 = vpack.c.bf16 %v390_v44, %v389_v43 }
  0xcb   : > { %706 = vmatmul.msk.bf16.vlgmr.msra.gmra.mxu2 %vm414_vm0, %v391_v45  ;;  %719 = vmatmul.msk.bf16.vlgmr.msra.gmra.mxu3 %vm414_vm0, %v461_v46 }
 0x144   : > { %v427_v49 = vpop.f32.mrf.mxu1 }
 0x14c   : > { %v429_v55 = vpop.f32.mrf.mxu1 }
 0x14e   : > { %v456_v50 = vpop.f32.mrf.mxu2  ;;  %v491_v51 = vpop.f32.mrf.mxu3 }
 0x14f   : > { %v457_v52 = vadd.f32 %v456_v50, %v427_v49 }
 0x151   : > { %v496_v53 = vadd.f32 %v491_v51, %v457_v52 }
 0x153   : > { %v499_v59 = vadd.f32 %v816_v54, %v496_v53 }
 0x155   : > { %v501_v62 = vmax.f32 %v499_v59, 0.0 }
 0x156   : > { %v458_v56 = vpop.f32.mrf.mxu2  ;;  %v493_v58 = vpop.f32.mrf.mxu3 }
 0x157   : > { %v459_v57 = vadd.f32 %v458_v56, %v429_v55 }
 0x159   : > { %v497_v60 = vadd.f32 %v493_v58, %v459_v57 }
 0x15b   : > { %v500_v61 = vadd.f32 %v816_v54, %v497_v60 }
 0x15d   : > { %v502_v63 = vmax.f32 %v500_v61, 0.0 }
 0x15f   : > { %v503_v0 = vpack.c.bf16 %v502_v63, %v501_v62 }
 0x161   : > { %728 = vmatmul.msk.bf16.vlgmr.msrb.gmra.mxu1 %vm414_vm0, %v503_v0 }
 0x1de   : > { %v533_v2 = vpop.f32.mrf.mxu1 }
 0x1df   : > { %v534_v3 = vadd.f32 %v817_v1, %v533_v2 }
 0x1e1   : > { %v538_v4 = vadd.f32 %v534_v3, %v1087_v8 }
 0x1e3   : > { %540 = vst [vmem:[%s250_s9] sm:$0xff] %v538_v4 }
 0x1e6   : > { %v535_v5 = vpop.f32.mrf.mxu1 }
 0x1e7   : > { %v536_v6 = vadd.f32 %v817_v1, %v535_v5 }
 0x1e9   : > { %v539_v7 = vadd.f32 %v536_v6, %v1089_v9 }
 0x1eb   : > { %541 = vst [vmem:[%s250_s9 + $0x8] sm:$0xff] %v539_v7 }
 0x1ec   : > { %905 = shalt.err (!%p902_p8)
}
 0x1ed   : > { %s954_s25 = smov 128   ;;  %s955_s26 = smov 8  }
 0x1ee   : > { %759 = dma.vmem_to_hbm [thread:$0]  (%p1024_p5), %s556_s10, 256, %s558_s11, %s543_s12, %s954_s25, %s954_s25, %s955_s26  }
 0x1ef PF: > { %p776_p9 = scmp.ge.s32.totalorder %s948_s21, 2  ;;  %s572_s30 = sand.u32 1, %s936_s18  }
 0x1f0   : > { %s573_s6 = scalar_lea.sflag [#allocation4], %s572_s30 }
 0x1f1   : > { %p769_p10 = pnand %p776_p9, %p1028_p6 }
 0x1f3   : > { %p770_p11 = pneg %p769_p10 }
 0x1f5   : > { %931 = dma.done.wait (%p770_p11), %s573_s6, 256  }
 0x1f6   : > { %933 = vsyncadd (%p770_p11), %s573_s6, 4294967040  ;;  %p17_p12 = scmp.ge.s32.totalorder %s1011_s24, 4   ;;  %s1182_s18 = smov %s940_s19 }
 0x1f7   : > { %s1183_s19 = smov %s944_s20  ;;  %s1184_s20 = smov %s1022_s27 }
 0x1f8   : > { %s1185_s21 = smov %s1011_s24  ;;  %19 = sbr.rel (!%p17_p12) target bundleno = 5 (0x5), region = 86 }
 0x1fd   :  { %579 = vsyncpa [#allocation3], 1 }
 0x1fe   :  { %581 = vsyncpa [#allocation3 + $0x1], 1 }
 0x1ff   :  { %582 = vsyncpa [#allocation6], 1 }
 0x200   :  { %583 = vsyncpa [#allocation4], 1 }
 0x201   :  { %585 = vsyncpa [#allocation4 + $0x1], 1 }

</bundles_post_ra>
